<compile_context>
chip_gen: v7x
topology: tpu7x:2x2x1
jax: 0.10.0
libtpu: 0.0.40
codegen_flags: <defaults>
</compile_context>

<pallas_src>
import functools

import jax
import jax.numpy as jnp
from jax.experimental import pallas as pl
from jax.experimental.pallas import tpu as pltpu


def _vmem_budget_bytes() -> int:
    """Usable scoped-VMEM budget: physical capacity minus compiler headroom.

    ~48 MiB on v7x (64 MiB/TC), ~96 MiB on v5e/v6e (128 MiB).  Falls back to
    48 MiB (safe on every part) if the hardware query is unavailable.
    """
    try:
        phys = int(pltpu.get_tpu_info().vmem_capacity_bytes)
    except Exception:
        phys = 64 << 20          # assume the smallest-VMEM part (v7x)
    return int(min(phys - (16 << 20), phys * 3 // 4))


_VMEM_BUDGET = _vmem_budget_bytes()


def mlp_kernel(x_ref, w1_ref, b1_ref, w2_ref, b2_ref, out_ref):
    # x_ref : (TB, E) bf16  -- sum-pooled embeddings (1/L already folded into W1)
    # w1_ref: (E, U)  bf16, b1_ref: (1, U) f32
    # w2_ref: (U, C)  bf16, b2_ref: (1, C) f32
    # out_ref: (TB, C) f32
    h = jnp.tanh(
        jnp.dot(x_ref[...], w1_ref[...], preferred_element_type=jnp.float32)
        + b1_ref[...]
    )                                                              # (TB, U) f32
    o = (
        jnp.dot(h.astype(jnp.bfloat16), w2_ref[...],
                preferred_element_type=jnp.float32)
        + b2_ref[...]
    )                                                              # (TB, C) f32
    out_ref[...] = jnp.maximum(o, 0.0)


@functools.partial(jax.jit, static_argnames=("block_b",))
def mlp_forward(token_ids, emb_table, w1, b1, w2, b2, *, block_b=1024):
    """token_ids: (B, L) int32; emb_table: (V, E); returns (B, C) float32."""
    B, L = token_ids.shape
    V, E = emb_table.shape
    U = w1.shape[1]
    C = w2.shape[1]

    # ---- Batch tiling ------------------------------------------------------
    # Weights/biases are grid-resident (constant index maps); Pallas
    # double-buffers every input by default, so count them x2.  Activation
    # tiles (in + out) are double-buffered too.
    weight_bytes = 2 * (E * U * 2 + U * C * 2 + (U + C) * 4)
    row_bytes = 2 * (E * 2 + C * 4)          # (TB,E) bf16 in + (TB,C) f32 out, x2 bufs
    act_budget = max(_VMEM_BUDGET - weight_bytes - (8 << 20), 1 << 20)
    tb_vmem_cap = max(16, (act_budget // row_bytes) // 16 * 16)

    b16 = ((B + 15) // 16) * 16              # multiple of 16: bf16 sublane packing
    tb_target = min(max(16, (block_b // 16) * 16), tb_vmem_cap, b16)
    num_tiles = pl.cdiv(b16, tb_target)
    if b16 >= 32:
        num_tiles = max(num_tiles, 2)        # >= 2 grid steps -> both v7x TCs work
        num_tiles += num_tiles % 2           # even split balances the two TCs
    TB = ((pl.cdiv(b16, num_tiles) + 15) // 16) * 16
    B_pad = TB * num_tiles

    # Pad the cheap (B, L) int32 token ids -- NOT the (B, E) activations -- so
    # the gather below directly produces a padded (B_pad, E) tensor.
    if B_pad != B:
        token_ids = jnp.pad(token_ids, ((0, B_pad - B), (0, 0)))

    # --- Embedding gather + pooling: data-dependent lookup kept as JAX glue,
    #     pooled to (B_pad, E) BEFORE crossing the kernel boundary.
    x_sum = jnp.take(emb_table, token_ids, axis=0).sum(axis=1)     # (B_pad, E) f32

    # Fold the 1/L mean scale into W1 (one-time weight transform).
    w1_scaled = w1 * (1.0 / float(L))

    # Feed the MXU bf16; keep biases / accumulation / activations in f32.
    x_bf16 = x_sum.astype(jnp.bfloat16)
    w1_bf16 = w1_scaled.astype(jnp.bfloat16)
    w2_bf16 = w2.astype(jnp.bfloat16)
    b1_2d = b1.reshape(1, U).astype(jnp.float32)
    b2_2d = b2.reshape(1, C).astype(jnp.float32)

    # --- Explicit VMEM limit: 2x the true double-buffered footprint, capped
    #     by the part's budget, and never below the footprint itself.
    tile_bytes = TB * row_bytes
    footprint = tile_bytes + weight_bytes
    vmem_limit = int(min(max(2 * footprint, 8 << 20), _VMEM_BUDGET))
    vmem_limit = int(max(vmem_limit, min(footprint + (2 << 20), _VMEM_BUDGET)))

    out = pl.pallas_call(
        mlp_kernel,
        out_shape=jax.ShapeDtypeStruct((B_pad, C), jnp.float32),
        grid=(num_tiles,),
        in_specs=[
            pl.BlockSpec((TB, E), lambda i: (i, 0)),   # pooled activations
            pl.BlockSpec((E, U), lambda i: (0, 0)),    # W1 (grid-resident)
            pl.BlockSpec((1, U), lambda i: (0, 0)),    # b1
            pl.BlockSpec((U, C), lambda i: (0, 0)),    # W2 (grid-resident)
            pl.BlockSpec((1, C), lambda i: (0, 0)),    # b2
        ],
        out_specs=pl.BlockSpec((TB, C), lambda i: (i, 0)),
        compiler_params=pltpu.CompilerParams(
            dimension_semantics=("parallel",),
            vmem_limit_bytes=vmem_limit,
        ),
    )(x_bf16, w1_bf16, b1_2d, w2_bf16, b2_2d)

    return out[:B]


def xavier_normal(key, fan_in, fan_out):
    # torch.nn.init.xavier_normal_ with gain=1.0 (weights stored (in, out),
    # i.e. transposed relative to nn.Linear's (out, in)).
    std = (2.0 / (fan_in + fan_out)) ** 0.5
    return std * jax.random.normal(key, (fan_in, fan_out), dtype=jnp.float32)


if __name__ == "__main__":
    # Small, deterministic configuration consistent with MLPModel defaults.
    # (Perf tuning must be done at production shapes; this only checks correctness.)
    B, L = 8, 8          # batch size, sequence length
    V, E = 64, 32        # vocab size, embedding dim (= num_features)
    U, C = 32, 4         # hidden units, n_classes
    BIAS = 0.1

    key = jax.random.PRNGKey(0)
    k_emb, k_w1, k_w2, k_tok = jax.random.split(key, 4)

    # "pretrained" embedding vectors (emb.vectors), deterministic here
    emb_table = jax.random.normal(k_emb, (V, E), dtype=jnp.float32)

    # Linear weights: xavier_normal, biases: constant 0.1
    w1 = xavier_normal(k_w1, E, U)
    b1 = jnp.full((U,), BIAS, dtype=jnp.float32)
    w2 = xavier_normal(k_w2, U, C)
    b2 = jnp.full((C,), BIAS, dtype=jnp.float32)

    # token-index batch
    token_ids = jax.random.randint(k_tok, (B, L), minval=0, maxval=V, dtype=jnp.int32)

    out = mlp_forward(token_ids, emb_table, w1, b1, w2, b2)
    out = jax.block_until_ready(out)
    assert out.shape == (B, C)

    # Reference 1: numerically matched (same bf16 matmul inputs, f32 accumulation).
    x_sum_ref = jnp.take(emb_table, token_ids, axis=0).sum(axis=1)
    h_m = jnp.tanh(
        jnp.dot(x_sum_ref.astype(jnp.bfloat16),
                (w1 / float(L)).astype(jnp.bfloat16),
                preferred_element_type=jnp.float32) + b1)
    ref_m = jnp.maximum(
        jnp.dot(h_m.astype(jnp.bfloat16), w2.astype(jnp.bfloat16),
                preferred_element_type=jnp.float32) + b2, 0.0)
    assert jnp.allclose(out, ref_m, atol=1e-2, rtol=1e-2)

    # Reference 2: plain f32 PyTorch-equivalent forward (bf16 roundoff tolerance).
    x_f = jnp.mean(jnp.take(emb_table, token_ids, axis=0), axis=1)
    h_f = jnp.tanh(x_f @ w1 + b1)
    ref_f = jnp.maximum(h_f @ w2 + b2, 0.0)
    assert jnp.allclose(out, ref_f, atol=5e-2, rtol=5e-2)

    print("KERNEL_OK")
</pallas_src>

<mosaic_0001>
module attributes {stable_mosaic.version = 11 : i64} {
  func.func @mlp_kernel(%arg0: i32, %arg1: memref<16x32xbf16, #tpu.memory_space<vmem>>, %arg2: memref<32x32xbf16, #tpu.memory_space<vmem>>, %arg3: memref<1x32xf32, #tpu.memory_space<vmem>>, %arg4: memref<32x4xbf16, #tpu.memory_space<vmem>>, %arg5: memref<1x4xf32, #tpu.memory_space<vmem>>, %arg6: memref<16x4xf32, #tpu.memory_space<vmem>>) attributes {dimension_semantics = [#tpu.dimension_semantics<parallel>], iteration_bounds = array<i64: 1>, scalar_prefetch = 0 : i64, scratch_operands = 0 : i64, tpu.core_type = #tpu.core_type<tc>, window_params = [{transform_indices = @transform_0, window_bounds = array<i64: 16, 32>}, {pipeline_mode = #tpu.pipeline_mode<synchronous>, transform_indices = @transform_1, window_bounds = array<i64: 32, 32>}, {pipeline_mode = #tpu.pipeline_mode<synchronous>, transform_indices = @transform_2, window_bounds = array<i64: 1, 32>}, {pipeline_mode = #tpu.pipeline_mode<synchronous>, transform_indices = @transform_3, window_bounds = array<i64: 32, 4>}, {pipeline_mode = #tpu.pipeline_mode<synchronous>, transform_indices = @transform_4, window_bounds = array<i64: 1, 4>}, {transform_indices = @transform_5, window_bounds = array<i64: 16, 4>}]} {
    %c0 = arith.constant 0 : index
    %c0_0 = arith.constant 0 : index
    %0 = vector.load %arg1[%c0, %c0_0] : memref<16x32xbf16, #tpu.memory_space<vmem>>, vector<16x32xbf16>
    %c0_1 = arith.constant 0 : index
    %c0_2 = arith.constant 0 : index
    %1 = vector.load %arg2[%c0_1, %c0_2] : memref<32x32xbf16, #tpu.memory_space<vmem>>, vector<32x32xbf16>
    %cst = arith.constant dense<0.000000e+00> : vector<16x32xf32>
    %2 = tpu.matmul %0, %1, %cst {dimension_numbers = #tpu.dot_dimension_numbers<[1], [0], [0], [1], [0, 0, 1, 1], [], []>} : vector<16x32xbf16>, vector<32x32xbf16>, vector<16x32xf32> -> vector<16x32xf32>
    %c0_3 = arith.constant 0 : index
    %c0_4 = arith.constant 0 : index
    %3 = vector.load %arg3[%c0_3, %c0_4] : memref<1x32xf32, #tpu.memory_space<vmem>>, vector<1x32xf32>
    %4 = vector.broadcast %3 : vector<1x32xf32> to vector<16x32xf32>
    %5 = arith.addf %2, %4 : vector<16x32xf32>
    %6 = math.tanh %5 : vector<16x32xf32>
    %7 = arith.truncf %6 : vector<16x32xf32> to vector<16x32xbf16>
    %c0_5 = arith.constant 0 : index
    %c0_6 = arith.constant 0 : index
    %8 = vector.load %arg4[%c0_5, %c0_6] : memref<32x4xbf16, #tpu.memory_space<vmem>>, vector<32x4xbf16>
    %cst_7 = arith.constant dense<0.000000e+00> : vector<16x4xf32>
    %9 = tpu.matmul %7, %8, %cst_7 {dimension_numbers = #tpu.dot_dimension_numbers<[1], [0], [0], [1], [0, 0, 1, 1], [], []>} : vector<16x32xbf16>, vector<32x4xbf16>, vector<16x4xf32> -> vector<16x4xf32>
    %c0_8 = arith.constant 0 : index
    %c0_9 = arith.constant 0 : index
    %10 = vector.load %arg5[%c0_8, %c0_9] : memref<1x4xf32, #tpu.memory_space<vmem>>, vector<1x4xf32>
    %11 = vector.broadcast %10 : vector<1x4xf32> to vector<16x4xf32>
    %12 = arith.addf %9, %11 : vector<16x4xf32>
    %cst_10 = arith.constant 0.000000e+00 : f32
    %13 = vector.broadcast %cst_10 : f32 to vector<16x4xf32>
    %14 = arith.maximumf %12, %13 : vector<16x4xf32>
    %c0_11 = arith.constant 0 : index
    %c0_12 = arith.constant 0 : index
    %15 = vector.load %arg6[%c0_11, %c0_12] : memref<16x4xf32, #tpu.memory_space<vmem>>, vector<16x4xf32>
    tpu.vector_store %arg6[%c0_11, %c0_12], %14 {strides = array<i32>} : memref<16x4xf32, #tpu.memory_space<vmem>>, vector<16x4xf32>,
    return
  }
  func.func @transform_0(%arg0: i32) -> (i32, i32) {
    %c0_i32 = arith.constant 0 : i32
    %c0_i32_0 = arith.constant 0 : i32
    return %arg0, %c0_i32 : i32, i32
  }
  func.func @transform_1(%arg0: i32) -> (i32, i32) {
    %c0_i32 = arith.constant 0 : i32
    %c0_i32_0 = arith.constant 0 : i32
    %c0_i32_1 = arith.constant 0 : i32
    return %c0_i32, %c0_i32_0 : i32, i32
  }
  func.func @transform_2(%arg0: i32) -> (i32, i32) {
    %c0_i32 = arith.constant 0 : i32
    %c0_i32_0 = arith.constant 0 : i32
    %c0_i32_1 = arith.constant 0 : i32
    return %c0_i32, %c0_i32_0 : i32, i32
  }
  func.func @transform_3(%arg0: i32) -> (i32, i32) {
    %c0_i32 = arith.constant 0 : i32
    %c0_i32_0 = arith.constant 0 : i32
    %c0_i32_1 = arith.constant 0 : i32
    return %c0_i32, %c0_i32_0 : i32, i32
  }
  func.func @transform_4(%arg0: i32) -> (i32, i32) {
    %c0_i32 = arith.constant 0 : i32
    %c0_i32_0 = arith.constant 0 : i32
    %c0_i32_1 = arith.constant 0 : i32
    return %c0_i32, %c0_i32_0 : i32, i32
  }
  func.func @transform_5(%arg0: i32) -> (i32, i32) {
    %c0_i32 = arith.constant 0 : i32
    %c0_i32_0 = arith.constant 0 : i32
    return %arg0, %c0_i32 : i32, i32
  }
}

</mosaic_0001>

<bundles_post_ra>
// kernel: mlp_forward.1
= control target key start
LH: loop header
LB: loop body
LE: loop exit
PB: predicated region body
PF: predicated region fallthrough
CT: control target
= control target key end

     0   :  { %v217_v0 = vmov 0.0   ;;  %vm218_vm0 = vmmov 0   ;;  %vm51_vm1 = vcmask 261120   ;;  %vm168_vm2 = vcmask 31744   ;;  %s278_s1 = inlined_call_operand.vmem [shape: bf16[32,32], index: 1, kind: input, shape index: {}]   ;;  %s279_s0 = inlined_call_operand.vmem [shape: bf16[16,32], index: 0, kind: input, shape index: {}]   ;;  %s280_s3 = inlined_call_operand.vmem [shape: bf16[32,4], index: 3, kind: input, shape index: {}]   ;;  %s281_s2 = inlined_call_operand.vmem [shape: f32[1,32], index: 2, kind: input, shape index: {}]   ;;  %s282_s4 = inlined_call_operand.vmem [shape: f32[1,4], index: 4, kind: input, shape index: {}]   ;;  %s283_s5 = inlined_call_operand.vmem [shape: f32[16,4], index: 5, kind: output, shape index: {}]  }
   0x1   :  { %190 = vmatprep.subr.bf16.mxu0 %v217_v0  ;;  %v208_v1 = vld [vmem:[%s278_s1] sm:$0xff]   ;;  %194 = vmatprep.mubr.msk.bf16.mxu0 %vm218_vm0, %v217_v0  ;;  %v209_v2 = vld [vmem:[%s278_s1 + $0x8] sm:$0xff]  }
   0x2   :  { %198 = vmatprep.subr.bf16.mxu1 %v217_v0  ;;  %202 = vmatprep.mubr.msk.bf16.mxu1 %vm218_vm0, %v217_v0  ;;  %v210_v3 = vld [vmem:[%s279_s0] sm:$0xff]   ;;  %v212_v5 = vld [vmem:[%s280_s3 + $0x8] sm:$0xff]  }
   0x3   :  { %191 = vmatpush3.bf16.msra.mxu0 %v208_v1  ;;  %v211_v4 = vld [vmem:[%s280_s3] sm:$0xff]  }
   0x4   :  { %192 = vmatprep.subr.bf16.mxu0 %v217_v0  ;;  %199 = vmatpush3.bf16.msra.mxu1 %v211_v4  ;;  %v175_v6 = vld [vmem:[%s281_s2] ss:$0 sm:$0xff] }
   0x5   :  { %200 = vmatprep.subr.bf16.mxu1 %v217_v0  ;;  %v180_v16 = vld [vmem:[%s282_s4] ss:$0 sm:$0xff] }
   0x7   :  { %193 = vmatpush3.bf16.msra.mxu0 %v209_v2 }
   0x8   :  { %201 = vmatpush3.bf16.msra.mxu1 %v212_v5 }
   0xa   :  { %195 = vmatmul.mubr.msk.bf16.vlgmr.msra.gmra.mrb[0].mxu0 %vm51_vm1, %v210_v3 }
  0xdd   :  { %v89_v7 = vpop.f32.mrb[0].mxu0 }
  0xde   :  { %v90_v8 = vadd.f32 %v175_v6, %v89_v7  ;;  %v196_v9 = vpop.f32.mrb[1].mxu0 }
  0xdf   :  { %v92_v10 = vpop.f32.mrb[2].mxu0 }
  0xe0   :  { %v93_v11 = vadd.f32 %v175_v6, %v92_v10  ;;  %v197_v12 = vpop.f32.mrb[3].mxu0  ;;  %213 = vtanh.f32 %v90_v8 }
  0xe2   :  { %215 = vtanh.f32 %v93_v11 }
  0xea   :  { %v214_v13 = vpop.eup %213 }
  0xec   :  { %v216_v14 = vpop.eup %215 }
  0xed   :  { %v98_v15 = vpack.c.bf16 %v216_v14, %v214_v13 }
  0xef   :  { %203 = vmatmul.mubr.msk.bf16.vlgmr.msra.gmra.mrb[0].mxu1 %vm51_vm1, %v98_v15 }
 0x1c2   :  { %v159_v17 = vpop.f32.mrb[0].mxu1 }
 0x1c3   :  { %v160_v18 = vadd.f32 %v180_v16, %v159_v17  ;;  %v204_v19 = vpop.f32.mrb[1].mxu1 }
 0x1c4   :  { %v162_v20 = vpop.f32.mrb[2].mxu1 }
 0x1c5   :  { %v166_v21 = vmax.f32 %v160_v18, 0.0  ;;  %v163_v22 = vadd.f32 %v180_v16, %v162_v20  ;;  %v205_v23 = vpop.f32.mrb[3].mxu1 }
 0x1c7   :  { %169 = vst.msk [vmem:[%s283_s5] sm:$0xff] %vm168_vm2, %v166_v21  ;;  %v167_v24 = vmax.f32 %v163_v22, 0.0 }
 0x1c9   :  { %170 = vst.msk [vmem:[%s283_s5 + $0x8] sm:$0xff] %vm168_vm2, %v167_v24 }

</bundles_post_ra>
